<compile_context>
chip_gen: v6e
topology: v6e:2x2x1
jax: 0.10.0
libtpu: 0.0.40
codegen_flags: <defaults>
</compile_context>

<pallas_src>
import functools

import jax
import jax.numpy as jnp
from jax.experimental import pallas as pl
from jax.experimental.pallas import tpu as pltpu


# ----------------------------- helpers -------------------------------------- #


def _cdiv(a, b):
    return -(-a // b)


def _round_up(a, b):
    return _cdiv(a, b) * b


def _vmem_budget():
    """(vmem_limit_bytes, per-input-block byte target), per TPU generation."""
    cap = None
    try:
        cap = getattr(pltpu.get_tpu_info(), "vmem_capacity_bytes", None)
    except Exception:  # pragma: no cover - hardware query is best-effort
        cap = None
    if cap is not None and cap >= 96 * 1024 * 1024:
        # v5e / v6e: 128 MiB physical VMEM -> generous limit, larger blocks.
        return 64 * 1024 * 1024, 12 * 1024 * 1024
    # v7x (64 MiB physical VMEM) or unknown generation: stay conservative.
    return 48 * 1024 * 1024, 6 * 1024 * 1024


def _choose_hw_tiles(ho, wo, bytes_per_pos, block_target):
    """Pick (tho, two) output-tile sizes.

    `bytes_per_pos` = input bytes feeding one output position.  The fused
    channel (lane) axis is never tiled; only Ho/Wo are split, with cdiv grids
    and masked boundary blocks.  Ensures >=2 grid steps when possible so the
    two v7x TensorCores both get work.
    """
    if wo <= 8 or wo * bytes_per_pos <= block_target:
        two = wo                                   # full dim -> always legal
    else:
        two = max(8, (block_target // (bytes_per_pos * 8)) * 8)
        two = min(two, (wo // 8) * 8)              # tiled dim must be 8-aligned
    tho = int(max(1, min(ho, block_target // max(1, two * bytes_per_pos))))
    if _cdiv(ho, tho) * _cdiv(wo, two) < 2:        # split for megacore (v7x)
        if ho >= 2:
            tho = _cdiv(ho, 2)
        elif wo >= 16:
            two = max(8, (_cdiv(wo, 2) // 8) * 8)
    return tho, two


def _pad_lanes(xf):
    """Pad the fused channel (lane) axis up to a multiple of 128.

    Lane-dense output is the biggest single lever on this mem-bound op.  For
    real UNet stages Cf = 2*N*C is already a multiple of 128 -> no-op.
    """
    cf = xf.shape[-1]
    cfp = _round_up(cf, 128)
    if cfp != cf:
        xf = jnp.pad(xf, ((0, 0), (0, 0), (0, cfp - cf)))
    return xf, cf, cfp


# ----------------------------- kernels -------------------------------------- #


def _pool_sk_kernel(x_ref, o_ref, *, kh, kw, cfp):
    """stride == kernel path.

    x_ref: (tho, kh, two, kw*cfp) — free reshape of the channels-last input.
    o_ref: (tho, two, cfp).

    Every tap is a static leading-dim index + a 128-aligned lane slice; the
    reduction is a running elementwise max on the VPU (accumulator initialized
    from the first tap — no -inf fill, no upcast).
    """
    m = x_ref[:, 0, :, 0:cfp]
    for i in range(kh):
        for j in range(kw):
            if i == 0 and j == 0:
                continue
            m = jnp.maximum(m, x_ref[:, i, :, j * cfp:(j + 1) * cfp])
    o_ref[...] = m


def _max_over_taps_kernel(t_ref, o_ref, *, num_taps):
    """General-stride fallback.  t_ref: (num_taps, tho, two, cfp) decimated taps."""
    m = t_ref[0]
    for q in range(1, num_taps):
        m = jnp.maximum(m, t_ref[q])
    o_ref[...] = m


# ----------------------------- pallas wrappers ------------------------------ #


def _pool_stride_eq(xf, kh, kw, ho, wo):
    """stride == kernel (UNet downsampling) on channels-last xf (Hp, Wp, Cf)."""
    itemsize = jnp.dtype(xf.dtype).itemsize
    xf, cf, cfp = _pad_lanes(xf)
    # Floor-mode pooling: drop unused trailing rows/cols, then a *free*
    # row-major reshape exposes the kh x kw taps with zero HBM relayout.
    xf = xf[:ho * kh, :wo * kw, :]
    x4 = xf.reshape(ho, kh, wo, kw * cfp)

    vmem_limit, block_target = _vmem_budget()
    tho, two = _choose_hw_tiles(ho, wo, kh * kw * cfp * itemsize, block_target)
    grid = (_cdiv(ho, tho), _cdiv(wo, two))

    kernel = functools.partial(_pool_sk_kernel, kh=kh, kw=kw, cfp=cfp)
    out = pl.pallas_call(
        kernel,
        out_shape=jax.ShapeDtypeStruct((ho, wo, cfp), xf.dtype),
        grid=grid,
        in_specs=[pl.BlockSpec((tho, kh, two, kw * cfp),
                               lambda i, j: (i, 0, j, 0))],
        out_specs=pl.BlockSpec((tho, two, cfp), lambda i, j: (i, j, 0)),
        compiler_params=pltpu.CompilerParams(
            dimension_semantics=("parallel", "parallel"),
            vmem_limit_bytes=vmem_limit),
    )(x4)
    return out[:, :, :cf] if cfp != cf else out


def _pool_general(xf, kh, kw, sh, sw, ho, wo):
    """General stride (unused by the UNet): decimated-tap Pallas kernel.

    TODO(synk): halo-tiled kernel to avoid duplicating input bytes when
    stride < kernel (only affects the module's default stride=1 path).
    """
    itemsize = jnp.dtype(xf.dtype).itemsize
    xf, cf, cfp = _pad_lanes(xf)
    num_taps = kh * kw
    taps = []
    for i in range(kh):
        for j in range(kw):
            taps.append(jax.lax.slice(
                xf, (i, j, 0),
                (i + (ho - 1) * sh + 1, j + (wo - 1) * sw + 1, cfp),
                (sh, sw, 1)))
    t = jnp.stack(taps, axis=0)                       # (num_taps, ho, wo, cfp)

    vmem_limit, block_target = _vmem_budget()
    tho, two = _choose_hw_tiles(ho, wo, num_taps * cfp * itemsize, block_target)
    grid = (_cdiv(ho, tho), _cdiv(wo, two))

    kernel = functools.partial(_max_over_taps_kernel, num_taps=num_taps)
    out = pl.pallas_call(
        kernel,
        out_shape=jax.ShapeDtypeStruct((ho, wo, cfp), xf.dtype),
        grid=grid,
        in_specs=[pl.BlockSpec((num_taps, tho, two, cfp),
                               lambda i, j: (0, i, j, 0))],
        out_specs=pl.BlockSpec((tho, two, cfp), lambda i, j: (i, j, 0)),
        compiler_params=pltpu.CompilerParams(
            dimension_semantics=("parallel", "parallel"),
            vmem_limit_bytes=vmem_limit),
    )(t)
    return out[:, :, :cf] if cfp != cf else out


def complex_max_pool2d_channels_last(xf, kernel_size, stride):
    """Max-pool a real channels-last array (H, W, Cf); Cf fuses (re/im, N, C).

    This is the layout-free entry point a channels-last UNet port would call
    directly (no relayouts).  Returns (Ho, Wo, Cf).
    """
    kh, kw = kernel_size
    sh, sw = stride
    hp, wp, _ = xf.shape
    ho = (hp - kh) // sh + 1
    wo = (wp - kw) // sw + 1
    if (sh, sw) == (kh, kw):
        return _pool_stride_eq(xf, kh, kw, ho, wo)
    return _pool_general(xf, kh, kw, sh, sw, ho, wo)


def complex_max_pool2d(x, kernel_size, stride=1, padding=0):
    """Pallas-backed equivalent of ComplexMaxPool2D.forward.

    x: complex array of shape (N, C, H, W)  [NCHW, like PyTorch].
    """
    if isinstance(kernel_size, int):
        kernel_size = (kernel_size, kernel_size)
    if isinstance(stride, int):
        stride = (stride, stride)
    if isinstance(padding, int):
        padding = (padding, padding)

    n, c, h, w = x.shape
    cf = 2 * n * c

    # Boundary relayout only: real/imag split + channels-last transpose fuse
    # into one XLA pass (the real/imag extraction from interleaved complex is
    # unavoidable anyway).  A full UNet port keeps this layout across ops and
    # calls complex_max_pool2d_channels_last directly.
    xf = jnp.stack([jnp.real(x), jnp.imag(x)], axis=0)           # (2, N, C, H, W)
    xf = jnp.transpose(xf, (3, 4, 0, 1, 2)).reshape(h, w, cf)    # (H, W, 2*N*C)

    ph, pw = padding
    if ph or pw:
        xf = jnp.pad(xf, ((ph, ph), (pw, pw), (0, 0)),
                     constant_values=-jnp.inf)

    pooled = complex_max_pool2d_channels_last(xf, kernel_size, stride)
    ho, wo = pooled.shape[:2]

    pooled = pooled.reshape(ho, wo, 2, n, c)
    pooled = jnp.transpose(pooled, (2, 3, 4, 0, 1))              # (2, N, C, Ho, Wo)
    return jax.lax.complex(pooled[0], pooled[1])


# ----------------------------- reference & test ----------------------------- #


def _reference(x, kernel_size, stride, padding):
    """Pure-JAX reference (reduce_window max on real & imag)."""
    if isinstance(kernel_size, int):
        kernel_size = (kernel_size, kernel_size)
    if isinstance(stride, int):
        stride = (stride, stride)
    if isinstance(padding, int):
        padding = (padding, padding)
    kh, kw = kernel_size
    sh, sw = stride
    ph, pw = padding

    def pool(v):
        v = jnp.pad(v, ((0, 0), (0, 0), (ph, ph), (pw, pw)),
                    constant_values=-jnp.inf)
        return jax.lax.reduce_window(
            v, -jnp.inf, jax.lax.max,
            window_dimensions=(1, 1, kh, kw),
            window_strides=(1, 1, sh, sw),
            padding="VALID")

    return jax.lax.complex(pool(jnp.real(x)), pool(jnp.imag(x)))


if __name__ == "__main__":
    key = jax.random.PRNGKey(0)
    pool_fn = jax.jit(complex_max_pool2d, static_argnums=(1, 2, 3))

    # (N, C, H, W, kernel, stride, padding)
    cases = [
        (2, 4, 16, 16, 2, 2, 0),    # UNet downsampling pool; Cf=16 -> lane-pad path
        (1, 64, 16, 16, 2, 2, 0),   # UNet-like channel count; Cf=128 lane-dense
        (2, 4, 16, 16, 2, 1, 0),    # module default stride=1 (general fallback)
    ]

    for idx, (N, C, H, W, ks, st, pad) in enumerate(cases):
        kr, ki = jax.random.split(jax.random.fold_in(key, idx))
        x_real = jax.random.normal(kr, (N, C, H, W), dtype=jnp.float32)
        x_imag = jax.random.normal(ki, (N, C, H, W), dtype=jnp.float32)
        x = jax.lax.complex(x_real, x_imag)

        out = pool_fn(x, ks, st, pad)
        out = jax.block_until_ready(out)
        ref = _reference(x, ks, st, pad)

        assert out.shape == ref.shape, (out.shape, ref.shape)
        assert out.dtype == jnp.complex64
        assert jnp.allclose(jnp.real(out), jnp.real(ref))
        assert jnp.allclose(jnp.imag(out), jnp.imag(ref))

    print("KERNEL_OK")
</pallas_src>

<mosaic_0001>
module attributes {stable_mosaic.version = 11 : i64} {
  func.func @_pool_sk_kernel(%arg0: i32, %arg1: i32, %arg2: memref<4x2x8x256xf32, #tpu.memory_space<vmem>>, %arg3: memref<4x8x128xf32, #tpu.memory_space<vmem>>) attributes {dimension_semantics = [#tpu.dimension_semantics<parallel>, #tpu.dimension_semantics<parallel>], iteration_bounds = array<i64: 2, 1>, scalar_prefetch = 0 : i64, scratch_operands = 0 : i64, tpu.core_type = #tpu.core_type<tc>, window_params = [{transform_indices = @transform_0, window_bounds = array<i64: 4, 2, 8, 256>}, {transform_indices = @transform_1, window_bounds = array<i64: 4, 8, 128>}]} {
    %c0 = arith.constant 0 : index
    %c0_0 = arith.constant 0 : index
    %c0_1 = arith.constant 0 : index
    %c0_2 = arith.constant 0 : index
    %0 = vector.load %arg2[%c0, %c0_0, %c0_1, %c0_2] : memref<4x2x8x256xf32, #tpu.memory_space<vmem>>, vector<4x1x8x128xf32>
    %1 = vector.shape_cast %0 : vector<4x1x8x128xf32> to vector<4x8x128xf32>
    %c0_3 = arith.constant 0 : index
    %c0_4 = arith.constant 0 : index
    %c0_5 = arith.constant 0 : index
    %c128 = arith.constant 128 : index
    %2 = vector.load %arg2[%c0_3, %c0_4, %c0_5, %c128] : memref<4x2x8x256xf32, #tpu.memory_space<vmem>>, vector<4x1x8x128xf32>
    %3 = vector.shape_cast %2 : vector<4x1x8x128xf32> to vector<4x8x128xf32>
    %4 = arith.maximumf %1, %3 : vector<4x8x128xf32>
    %c0_6 = arith.constant 0 : index
    %c1 = arith.constant 1 : index
    %c0_7 = arith.constant 0 : index
    %c0_8 = arith.constant 0 : index
    %5 = vector.load %arg2[%c0_6, %c1, %c0_7, %c0_8] : memref<4x2x8x256xf32, #tpu.memory_space<vmem>>, vector<4x1x8x128xf32>
    %6 = vector.shape_cast %5 : vector<4x1x8x128xf32> to vector<4x8x128xf32>
    %7 = arith.maximumf %4, %6 : vector<4x8x128xf32>
    %c0_9 = arith.constant 0 : index
    %c1_10 = arith.constant 1 : index
    %c0_11 = arith.constant 0 : index
    %c128_12 = arith.constant 128 : index
    %8 = vector.load %arg2[%c0_9, %c1_10, %c0_11, %c128_12] : memref<4x2x8x256xf32, #tpu.memory_space<vmem>>, vector<4x1x8x128xf32>
    %9 = vector.shape_cast %8 : vector<4x1x8x128xf32> to vector<4x8x128xf32>
    %10 = arith.maximumf %7, %9 : vector<4x8x128xf32>
    %c0_13 = arith.constant 0 : index
    %c0_14 = arith.constant 0 : index
    %c0_15 = arith.constant 0 : index
    %11 = vector.load %arg3[%c0_13, %c0_14, %c0_15] : memref<4x8x128xf32, #tpu.memory_space<vmem>>, vector<4x8x128xf32>
    tpu.vector_store %arg3[%c0_13, %c0_14, %c0_15], %10 {strides = array<i32>} : memref<4x8x128xf32, #tpu.memory_space<vmem>>, vector<4x8x128xf32>,
    return
  }
  func.func @transform_0(%arg0: i32, %arg1: i32) -> (i32, i32, i32, i32) {
    %c0_i32 = arith.constant 0 : i32
    %c0_i32_0 = arith.constant 0 : i32
    %c0_i32_1 = arith.constant 0 : i32
    return %arg0, %c0_i32, %arg1, %c0_i32_0 : i32, i32, i32, i32
  }
  func.func @transform_1(%arg0: i32, %arg1: i32) -> (i32, i32, i32) {
    %c0_i32 = arith.constant 0 : i32
    %c0_i32_0 = arith.constant 0 : i32
    return %arg0, %arg1, %c0_i32 : i32, i32, i32
  }
}

</mosaic_0001>

<bundles_post_ra>
// kernel: custom-call.1
= control target key start
LH: loop header
LB: loop body
LE: loop exit
PB: predicated region body
PF: predicated region fallthrough
CT: control target
= control target key end

     0   :  { %s51_s0 = inlined_call_operand.hbm [shape: c64[2,4,16,16], index: 0, kind: input, shape index: {}]   ;;  %s52_s1 = inlined_call_operand.vmem [shape: f32[2,4,16,16], index: 1, kind: output, shape index: {}]  }
   0x1   :  { %s2_s8 = scalar_lea.hbm %s51_s0, 2048 }
   0x2   :  { %3 = vsyncpa [#allocation0], 0  ;;  %s4_s11 = sshll.u32 %s52_s1, 4  ;;  %s5_s11 = int_to_ptr.vmem [resolvable:$true] %s4_s11 }
   0x3   :  { %s20_s12 = scalar_lea.vmem %s5_s11, 2048  ;;  %p25_p1 = scmp.lt.s32.totalorder %s5_s11, %s5_s11 }
   0x4   :  { %p21_p0 = scmp.ne.s32.totalorder %s5_s11, %s20_s12  ;;  %p26_p2 = scmp.lt.s32.totalorder %s20_s12, %s20_s12 }
   0x6   :  { %p27_p3 = por %p26_p2, %p25_p1 }
   0x8   :  { %p28_p4 = pnand %p27_p3, %p21_p0 }
   0xa   :  { %31 = shalt.err (!%p28_p4)  }
   0xb   :  { %7 = dma.hbm_to_vmem [thread:$0]  %s2_s8, 2048, %s5_s11, [#allocation0] }
   0xc   :  { %33 = dma.done.wait [#allocation0], 2048  }
   0xd   :  { %34 = vsyncadd [#allocation0], 4294965248 }
   0xe   :  { %9 = vsyncpa [#allocation0], 1 }

// kernel: custom-call
= control target key start
LH: loop header
LB: loop body
LE: loop exit
PB: predicated region body
PF: predicated region fallthrough
CT: control target
= control target key end

     0   :  { %2 = vsyncpa [#allocation0], 0  ;;  %s47_s0 = inlined_call_operand.hbm [shape: c64[2,4,16,16], index: 0, kind: input, shape index: {}]   ;;  %s48_s1 = inlined_call_operand.vmem [shape: f32[2,4,16,16], index: 1, kind: output, shape index: {}]  }
   0x1   :  { %s3_s8 = sshll.u32 %s48_s1, 4  ;;  %s4_s8 = int_to_ptr.vmem [resolvable:$true] %s3_s8 }
   0x2   :  { %s17_s9 = scalar_lea.vmem %s4_s8, 2048  ;;  %p22_p1 = scmp.lt.s32.totalorder %s4_s8, %s4_s8 }
   0x3   :  { %p18_p0 = scmp.ne.s32.totalorder %s4_s8, %s17_s9  ;;  %p23_p2 = scmp.lt.s32.totalorder %s17_s9, %s17_s9 }
   0x5   :  { %p24_p3 = por %p23_p2, %p22_p1 }
   0x7   :  { %p25_p4 = pnand %p24_p3, %p18_p0 }
   0x9   :  { %28 = shalt.err (!%p25_p4)  }
   0xa   :  { %6 = dma.hbm_to_vmem [thread:$0]  %s47_s0, 2048, %s4_s8, [#allocation0] }
   0xb   :  { %29 = dma.done.wait [#allocation0], 2048  }
   0xc   :  { %30 = vsyncadd [#allocation0], 4294965248 }
   0xd   :  { %8 = vsyncpa [#allocation0], 1 }

// kernel: custom-call.2
= control target key start
LH: loop header
LB: loop body
LE: loop exit
PB: predicated region body
PF: predicated region fallthrough
CT: control target
= control target key end

     0   :  { %s92_s0 = inlined_call_operand.vmem [shape: f32[2,4,8,8], index: 0, kind: input, shape index: {}]   ;;  %s93_s1 = inlined_call_operand.vmem [shape: f32[2,4,8,8], index: 1, kind: input, shape index: {}]   ;;  %s94_s2 = inlined_call_operand.hbm [shape: c64[2,4,8,8], index: 2, kind: output, shape index: {}]  }
   0x1   :  { %s3_s11 = scalar_lea.hbm %s94_s2, 1024 }
   0x2   :  { %4 = vsyncpa [#allocation0], 0  ;;  %s5_s14 = sshll.u32 %s92_s0, 4  ;;  %s6_s14 = int_to_ptr.vmem [resolvable:$true] %s5_s14 }
   0x3   :  { %s18_s15 = scalar_lea.vmem %s6_s14, 1024  ;;  %p23_p1 = scmp.lt.s32.totalorder %s6_s14, %s6_s14 }
   0x4   :  { %p19_p0 = scmp.ne.s32.totalorder %s6_s14, %s18_s15  ;;  %p24_p2 = scmp.lt.s32.totalorder %s18_s15, %s18_s15 }
   0x6   :  { %p25_p3 = por %p24_p2, %p23_p1 }
   0x8   :  { %p26_p4 = pnand %p25_p3, %p19_p0 }
   0xa   :  { %29 = shalt.err (!%p26_p4)  }
   0xb   :  { %8 = dma.vmem_to_hbm [thread:$0]  %s6_s14, 1024, %s94_s2, [#allocation0] }
   0xc   :  { %61 = dma.done.wait [#allocation0], 1024  }
   0xd   :  { %62 = vsyncadd [#allocation0], 4294966272 }
   0xe   :  { %10 = vsyncpa [#allocation0], 1 }
   0xf   :  { %11 = vsyncpa [#allocation1], 0  ;;  %s12_s0 = sshll.u32 %s93_s1, 4  ;;  %s13_s0 = int_to_ptr.vmem [resolvable:$true] %s12_s0 }
  0x10   :  { %s38_s20 = scalar_lea.vmem %s13_s0, 1024  ;;  %p43_p6 = scmp.lt.s32.totalorder %s13_s0, %s13_s0 }
  0x11   :  { %p39_p5 = scmp.ne.s32.totalorder %s13_s0, %s38_s20  ;;  %p44_p7 = scmp.lt.s32.totalorder %s38_s20, %s38_s20 }
  0x13   :  { %p45_p8 = por %p44_p7, %p43_p6 }
  0x15   :  { %p46_p9 = pnand %p45_p8, %p39_p5 }
  0x17   :  { %49 = shalt.err (!%p46_p9)  }
  0x18   :  { %15 = dma.vmem_to_hbm [thread:$0]  %s13_s0, 1024, %s3_s11, [#allocation1] }
  0x19   :  { %63 = dma.done.wait [#allocation1], 1024  }
  0x1a   :  { %64 = vsyncadd [#allocation1], 4294966272 }
  0x1b   :  { %17 = vsyncpa [#allocation1], 1 }

// kernel: complex_max_pool2d.1
= control target key start
LH: loop header
LB: loop body
LE: loop exit
PB: predicated region body
PF: predicated region fallthrough
CT: control target
= control target key end

     0   :  { %s353_s6 = smov 0   ;;  %s355_s7 = smov 0   ;;  %s386_s0 = inlined_call_operand.vmem [shape: f32[8,2,8,256], index: 0, kind: input, shape index: {}]   ;;  %s387_s1 = inlined_call_operand.vmem [shape: f32[8,8,128], index: 1, kind: output, shape index: {}]  }
   0x1   :  { %s357_s8 = smov 0  }
   0x2 LB: > { %s23_s9 = sadd.s32 1, %s337_s7  ;;  %p278_p0 = scmp.ge.s32.totalorder %s341_s8, 1  ;;  %s341_s8 = sphi %s357_s8, %s11_s8   ;;  %s337_s7 = sphi %s355_s7, %s389_s7   ;;  %s333_s6 = sphi %s353_s6, %s388_s6  }
   0x3   : > { %p25_p1 = scmp.ge.s32.totalorder %s23_s9, 2  ;;  %p109_p2 = scmp.lt.s32.totalorder %s341_s8, 3 }
   0x5   : > { %s391_s9 = smov (%p25_p1, %s23_s9), 0  ;;  %p110_p3 = pnand %p278_p0, %p109_p2 }
   0x6   : > { %s279_s10 = sshll.u32 (!%p110_p3), %s333_s6, 2 }
   0x7   : > { %113 = sbr.rel (%p110_p3) target bundleno = 27 (0x1b), region = 24  ;;  %p138_p4 = scmp.lt.s32.totalorder (!%p110_p3), %s279_s10, 7 }
   0xc   : > { %s393_s10 = smov (!%p138_p4, %s279_s10), 7 }
   0xd   : > { %s294_s11 = sshll.u32 %s393_s10, 5  ;;  %s283_s15 = sshll.u32 %s393_s10, 3 }
   0xe   : > { %s146_s14 = scalar_lea.vmem %s386_s0, %s294_s11  ;;  %s155_s18 = scalar_lea.vmem %s387_s1, %s283_s15 }
   0xf   : > { %v157_v0 = vld [vmem:[%s146_s14] sm:$0xff]  ;;  %v161_v1 = vld [vmem:[%s146_s14 + $0x8] sm:$0xff]  ;;  %v284_v2 = vld [vmem:[%s146_s14 + $0x10] sm:$0xff] }
  0x10   : > { %v165_v3 = vmax.f32 %v157_v0, %v161_v1  ;;  %v158_v4 = vld [vmem:[%s146_s14 + $0x20] sm:$0xff]  ;;  %v162_v5 = vld [vmem:[%s146_s14 + $0x28] sm:$0xff]  ;;  %v288_v6 = vld [vmem:[%s146_s14 + $0x18] sm:$0xff] }
  0x11   : > { %v166_v7 = vmax.f32 %v158_v4, %v162_v5  ;;  %v285_v8 = vld [vmem:[%s146_s14 + $0x30] sm:$0xff]  ;;  %v159_v9 = vld [vmem:[%s146_s14 + $0x40] sm:$0xff]  ;;  %v289_v11 = vld [vmem:[%s146_s14 + $0x38] sm:$0xff] }
  0x12   : > { %v174_v10 = vmax.f32 %v165_v3, %v284_v2  ;;  %v163_v12 = vld [vmem:[%s146_s14 + $0x48] sm:$0xff]  ;;  %v286_v13 = vld [vmem:[%s146_s14 + $0x50] sm:$0xff]  ;;  %v160_v16 = vld [vmem:[%s146_s14 + $0x60] sm:$0xff] }
  0x13   : > { %v175_v14 = vmax.f32 %v166_v7, %v285_v8  ;;  %v167_v15 = vmax.f32 %v159_v9, %v163_v12  ;;  %v164_v17 = vld [vmem:[%s146_s14 + $0x68] sm:$0xff]  ;;  %v287_v18 = vld [vmem:[%s146_s14 + $0x70] sm:$0xff]  ;;  %v290_v20 = vld [vmem:[%s146_s14 + $0x58] sm:$0xff] }
  0x14   : > { %v182_v19 = vmax.f32 %v174_v10, %v288_v6  ;;  %v168_v21 = vmax.f32 %v160_v16, %v164_v17  ;;  %v291_v24 = vld [vmem:[%s146_s14 + $0x78] sm:$0xff] }
  0x15   : > { %v183_v22 = vmax.f32 %v175_v14, %v289_v11  ;;  %v176_v23 = vmax.f32 %v167_v15, %v286_v13 }
  0x16   : > { %186 = vst [vmem:[%s155_s18] sm:$0xff] %v182_v19  ;;  %v177_v25 = vmax.f32 %v168_v21, %v287_v18 }
  0x17   : > { %187 = vst [vmem:[%s155_s18 + $0x8] sm:$0xff] %v183_v22  ;;  %v184_v26 = vmax.f32 %v176_v23, %v290_v20 }
  0x18   : > { %v185_v27 = vmax.f32 %v177_v25, %v291_v24 }
  0x19   : > { %188 = vst [vmem:[%s155_s18 + $0x10] sm:$0xff] %v184_v26 }
  0x1a   : > { %189 = vst [vmem:[%s155_s18 + $0x18] sm:$0xff] %v185_v27 }
  0x1b PF: > { %s11_s8 = sadd.s32 1, %s341_s8   ;;  %s388_s6 = smov %s337_s7 }
  0x1c   : > { %p8_p5 = scmp.ge.s32.totalorder %s11_s8, 4   ;;  %s389_s7 = smov %s391_s9 }
  0x1e   :  { %10 = sbr.rel (!%p8_p5) target bundleno = 2 (0x2), region = 55 }

</bundles_post_ra>
